<compile_context>
chip_gen: v5e
topology: v5e:2x2
jax: 0.10.0
libtpu: 0.0.40
codegen_flags: <defaults>
</compile_context>

<pallas_src>
import math

import jax
import jax.numpy as jnp
from jax.experimental import pallas as pl
from jax.experimental.pallas import tpu as pltpu


LANE = 128
SUBLANE = 8


# ---------------------------------------------------------------------------
# Pallas kernel: per-block partial sum of |a - b| (lane-dense, VPU-only).
# ---------------------------------------------------------------------------
def _l1_partial_kernel(a_ref, b_ref, out_ref):
    diff = a_ref[...].astype(jnp.float32) - b_ref[...].astype(jnp.float32)
    absdiff = jnp.abs(diff)
    # (block_rows, 128) -> (block_rows//8, 8, 128); fold the leading axis with
    # elementwise VPU adds.  Cross-lane reduction happens outside the kernel
    # on the tiny (grid, 8, 128) partial tensor.
    out_ref[...] = jnp.sum(absdiff.reshape(-1, SUBLANE, LANE), axis=0)


def l1_loss_pallas(a, b, *, max_block_rows=2048):
    """mean(|a - b|) over all elements, computed with a Pallas TPU kernel."""
    assert a.shape == b.shape, (a.shape, b.shape)
    total = math.prod(a.shape)

    # Lane-dense layout: flatten, pad both operands with the SAME value (0) so
    # padded positions contribute |0-0| = 0, reshape to (rows, 128).
    rows = pl.cdiv(total, LANE)
    rows = ((rows + SUBLANE - 1) // SUBLANE) * SUBLANE
    block_rows = min(max_block_rows, rows)
    rows = ((rows + block_rows - 1) // block_rows) * block_rows
    padded = rows * LANE

    a_flat = a.reshape(-1)
    b_flat = b.reshape(-1)
    pad = padded - total
    if pad:
        a_flat = jnp.pad(a_flat, (0, pad))
        b_flat = jnp.pad(b_flat, (0, pad))
    a2 = a_flat.reshape(rows, LANE)
    b2 = b_flat.reshape(rows, LANE)

    grid = (rows // block_rows,)

    partials = pl.pallas_call(
        _l1_partial_kernel,
        out_shape=jax.ShapeDtypeStruct((grid[0], SUBLANE, LANE), jnp.float32),
        grid_spec=pltpu.PrefetchScalarGridSpec(
            num_scalar_prefetch=0,
            grid=grid,
            in_specs=[
                pl.BlockSpec((block_rows, LANE), lambda i: (i, 0)),
                pl.BlockSpec((block_rows, LANE), lambda i: (i, 0)),
            ],
            out_specs=pl.BlockSpec((None, SUBLANE, LANE), lambda i: (i, 0, 0)),
        ),
        compiler_params=pltpu.CompilerParams(
            dimension_semantics=("parallel",)),
    )(a2, b2)

    # Final tiny reduction + mean scale (true element count, not padded).
    return jnp.sum(partials) * jnp.float32(1.0 / total)


# ---------------------------------------------------------------------------
# Deterministic mel-spectrogram stand-in (the module's injected dependency).
# Plain JAX glue: framing + real-DFT power + mel filterbank.
# ---------------------------------------------------------------------------
def _mel_filterbank(n_freq, n_mels, sample_rate):
    def hz_to_mel(f):
        return 2595.0 * jnp.log10(1.0 + f / 700.0)

    def mel_to_hz(m):
        return 700.0 * (10.0 ** (m / 2595.0) - 1.0)

    f_max = sample_rate / 2.0
    mel_pts = jnp.linspace(hz_to_mel(jnp.float32(0.0)),
                           hz_to_mel(jnp.float32(f_max)), n_mels + 2)
    hz_pts = mel_to_hz(mel_pts)
    freqs = jnp.linspace(0.0, f_max, n_freq)

    f = freqs[:, None]
    lower = hz_pts[:-2][None, :]
    center = hz_pts[1:-1][None, :]
    upper = hz_pts[2:][None, :]
    up = (f - lower) / (center - lower)
    down = (upper - f) / (upper - center)
    return jnp.maximum(0.0, jnp.minimum(up, down)).astype(jnp.float32)


def make_melspectrogram(n_fft=64, hop=16, n_mels=8, sample_rate=16000):
    n_freq = n_fft // 2 + 1
    window = (0.5 - 0.5 * jnp.cos(
        2.0 * jnp.pi * jnp.arange(n_fft) / n_fft)).astype(jnp.float32)
    k = jnp.arange(n_fft, dtype=jnp.float32)[:, None]
    f = jnp.arange(n_freq, dtype=jnp.float32)[None, :]
    ang = 2.0 * jnp.pi * k * f / n_fft
    cos_m = jnp.cos(ang)
    sin_m = -jnp.sin(ang)
    mel_fb = _mel_filterbank(n_freq, n_mels, sample_rate)  # (n_freq, n_mels)

    def melspectrogram(x):  # x: (B, samples) float32
        B, L = x.shape
        n_frames = 1 + (L - n_fft) // hop
        idx = (jnp.arange(n_frames)[:, None] * hop
               + jnp.arange(n_fft)[None, :])
        frames = x[:, idx] * window                  # (B, n_frames, n_fft)
        re = frames @ cos_m
        im = frames @ sin_m
        power = re * re + im * im                    # (B, n_frames, n_freq)
        mel = power @ mel_fb                         # (B, n_frames, n_mels)
        return jnp.transpose(mel, (0, 2, 1))         # (B, n_mels, n_frames)

    return melspectrogram


# ---------------------------------------------------------------------------
# L1Loss module equivalent.
# ---------------------------------------------------------------------------
class L1LossPallas:
    def __init__(self, melspectrogram, pad_value):
        self.melspectrogram = melspectrogram
        self.pad_value = float(pad_value)

    def __call__(self, melspec, fake):
        melspec_fake = self.melspectrogram(fake)
        ln = melspec_fake.shape[-1] - melspec.shape[-1]
        if ln < 0:
            melspec_fake = jnp.pad(
                melspec_fake, ((0, 0), (0, 0), (0, -ln)),
                constant_values=self.pad_value)
        else:
            melspec = jnp.pad(
                melspec, ((0, 0), (0, 0), (0, ln)),
                constant_values=self.pad_value)
        return l1_loss_pallas(melspec, melspec_fake)


if __name__ == "__main__":
    key = jax.random.PRNGKey(0)
    k1, k2 = jax.random.split(key)

    B, n_mels, T_mel = 2, 8, 16
    n_samples = 256          # -> 13 mel frames (n_fft=64, hop=16) => pad branch

    melspec = jax.random.normal(k1, (B, n_mels, T_mel), dtype=jnp.float32)
    fake = 0.1 * jax.random.normal(k2, (B, n_samples), dtype=jnp.float32)

    mel_fn = make_melspectrogram(n_fft=64, hop=16, n_mels=n_mels)
    loss_mod = L1LossPallas(mel_fn, pad_value=-4.0)

    loss = loss_mod(melspec, fake)
    loss = jax.block_until_ready(loss)

    # Pure-JAX reference for the same forward.
    mf = mel_fn(fake)
    ln = mf.shape[-1] - melspec.shape[-1]
    if ln < 0:
        mf_ref = jnp.pad(mf, ((0, 0), (0, 0), (0, -ln)), constant_values=-4.0)
        ms_ref = melspec
    else:
        mf_ref = mf
        ms_ref = jnp.pad(melspec, ((0, 0), (0, 0), (0, ln)),
                         constant_values=-4.0)
    ref = jnp.mean(jnp.abs(ms_ref - mf_ref))

    assert math.isfinite(float(loss))
    assert abs(float(loss) - float(ref)) < 1e-4 * max(1.0, abs(float(ref))), (
        float(loss), float(ref))

    print("KERNEL_OK")
</pallas_src>

<mosaic_0001>
module attributes {stable_mosaic.version = 11 : i64} {
  func.func @_l1_partial_kernel(%arg0: i32, %arg1: memref<8x128xf32, #tpu.memory_space<vmem>>, %arg2: memref<8x128xf32, #tpu.memory_space<vmem>>, %arg3: memref<1x8x128xf32, #tpu.memory_space<vmem>>) attributes {dimension_semantics = [#tpu.dimension_semantics<parallel>], iteration_bounds = array<i64: 1>, scalar_prefetch = 0 : i64, scratch_operands = 0 : i64, tpu.core_type = #tpu.core_type<tc>, window_params = [{transform_indices = @transform_0, window_bounds = array<i64: 8, 128>}, {transform_indices = @transform_1, window_bounds = array<i64: 8, 128>}, {transform_indices = @transform_2, window_bounds = array<i64: 1, 8, 128>}]} {
    %c0 = arith.constant 0 : index
    %c0_0 = arith.constant 0 : index
    %0 = vector.load %arg1[%c0, %c0_0] : memref<8x128xf32, #tpu.memory_space<vmem>>, vector<8x128xf32>
    %c0_1 = arith.constant 0 : index
    %c0_2 = arith.constant 0 : index
    %1 = vector.load %arg2[%c0_1, %c0_2] : memref<8x128xf32, #tpu.memory_space<vmem>>, vector<8x128xf32>
    %2 = arith.subf %0, %1 : vector<8x128xf32>
    %3 = math.absf %2 : vector<8x128xf32>
    %4 = vector.shape_cast %3 : vector<8x128xf32> to vector<1x8x128xf32>
    %cst = arith.constant dense<0.000000e+00> : vector<8x128xf32>
    %5 = vector.multi_reduction <add>, %4, %cst [0] : vector<1x8x128xf32> to vector<8x128xf32>
    %c0_3 = arith.constant 0 : index
    %c0_4 = arith.constant 0 : index
    %c0_5 = arith.constant 0 : index
    %6 = vector.load %arg3[%c0_3, %c0_4, %c0_5] : memref<1x8x128xf32, #tpu.memory_space<vmem>>, vector<1x8x128xf32>
    %7 = vector.shape_cast %6 : vector<1x8x128xf32> to vector<8x128xf32>
    %8 = vector.shape_cast %5 : vector<8x128xf32> to vector<1x8x128xf32>
    tpu.vector_store %arg3[%c0_3, %c0_4, %c0_5], %8 {strides = array<i32>} : memref<1x8x128xf32, #tpu.memory_space<vmem>>, vector<1x8x128xf32>,
    return
  }
  func.func @transform_0(%arg0: i32) -> (i32, i32) {
    %c0_i32 = arith.constant 0 : i32
    %c0_i32_0 = arith.constant 0 : i32
    return %arg0, %c0_i32 : i32, i32
  }
  func.func @transform_1(%arg0: i32) -> (i32, i32) {
    %c0_i32 = arith.constant 0 : i32
    %c0_i32_0 = arith.constant 0 : i32
    return %arg0, %c0_i32 : i32, i32
  }
  func.func @transform_2(%arg0: i32) -> (i32, i32, i32) {
    %c0_i32 = arith.constant 0 : i32
    %c0_i32_0 = arith.constant 0 : i32
    %c0_i32_1 = arith.constant 0 : i32
    return %arg0, %c0_i32, %c0_i32_0 : i32, i32, i32
  }
}

</mosaic_0001>

<bundles_post_ra>
// kernel: tpu_custom_call.1
= control target key start
LH: loop header
LB: loop body
LE: loop exit
PB: predicated region body
PF: predicated region fallthrough
CT: control target
= control target key end

     0   :  { %7 = vsyncpa [#allocation3], 0  ;;  %s172_s0 = inlined_call_operand.hbm [shape: f32[8,128], index: 0, kind: input, shape index: {}]   ;;  %s173_s1 = inlined_call_operand.hbm [shape: f32[8,128], index: 1, kind: input, shape index: {}]   ;;  %s174_s2 = inlined_call_operand.hbm [shape: f32[1,8,128], index: 2, kind: output, shape index: {}]  }
   0x1   :  { %8 = vsyncpa [#allocation6], 0 }
   0x2   :  { %9 = vsyncpa [#allocation4], 0  ;;  %s15_s11 = sshll.u32 %s172_s0, 4  ;;  %s145_s12 = smov [#allocation2]   ;;  %s16_s11 = int_to_ptr.hbm [resolvable:$true] %s15_s11 }
   0x3   :  { %s17_s13 = sshll.u32 %s145_s12, 4  ;;  %s26_s16 = sshll.u32 %s173_s1, 4  ;;  %s18_s13 = int_to_ptr.vmem [resolvable:$true] %s17_s13  ;;  %s27_s16 = int_to_ptr.hbm [resolvable:$true] %s26_s16 }
   0x4   :  { %20 = dma.hbm_to_vmem [thread:$0]  %s16_s11, 128, %s18_s13, [#allocation3]  }
   0x5   :  { %s146_s17 = smov [#allocation5]  }
   0x6   :  { %s28_s18 = sshll.u32 %s146_s17, 4  ;;  %s29_s18 = int_to_ptr.vmem [resolvable:$true] %s28_s18 }
   0x7   :  { %31 = dma.hbm_to_vmem [thread:$0]  %s27_s16, 128, %s29_s18, [#allocation6]  }
   0x8   :  { %139 = dma.done.wait [#allocation3], 128  }
   0x9   :  { %140 = vsyncadd [#allocation3], 4294967168 }
   0xa   :  { %141 = dma.done.wait [#allocation6], 128  }
   0xb   :  { %142 = vsyncadd [#allocation6], 4294967168  ;;  %v40_v0 = vld [vmem:[#allocation2] sm:$0xff]  ;;  %v41_v1 = vld [vmem:[#allocation5] sm:$0xff]  ;;  %s147_s0 = smov [#allocation7]   ;;  %s53_s22 = sshll.u32 %s174_s2, 4  ;;  %s54_s22 = int_to_ptr.hbm [resolvable:$true] %s53_s22 }
   0xc   :  { %s51_s19 = sshll.u32 %s147_s0, 4  ;;  %v42_v2 = vsub.f32 %v40_v0, %v41_v1  ;;  %s52_s19 = int_to_ptr.vmem [resolvable:$true] %s51_s19 }
   0xe   :  { %v43_v3 = vand.u32 2147483647, %v42_v2 }
  0x10   :  { %45 = vst [vmem:[#allocation7] sm:$0xff] %v43_v3 }
  0x11   :  { %56 = dma.vmem_to_hbm [thread:$0]  %s52_s19, 128, %s54_s22, [#allocation4]  }
  0x12   :  { %143 = dma.done.wait [#allocation4], 128  }
  0x13   :  { %144 = vsyncadd [#allocation4], 4294967168 }
  0x14   :  { %61 = vsyncpa [#allocation3], 1 }
  0x15   :  { %62 = vsyncpa [#allocation6], 1 }
  0x16   :  { %63 = vsyncpa [#allocation4], 1 }

</bundles_post_ra>
